<compile_context>
chip_gen: v6e
topology: v6e:2x2x1
jax: 0.10.0
libtpu: 0.0.40
codegen_flags: <defaults>
</compile_context>

<pallas_src>
import numpy as np
import jax
import jax.numpy as jnp
from jax.experimental import pallas as pl
from jax.experimental.pallas import tpu as pltpu


def _round_up(x, m):
    return ((x + m - 1) // m) * m


# ----------------------------------------------------------------------------
# Pallas kernel: two MXU matmuls (cos / sin halves of the windowed real DFT)
# against a transposed frame tile, then VPU square + add.
#   frames^T tile : (1, N, TM)  bf16
#   cos, sin      : (F, N)      bf16   (F = N//2 + 1, unpadded)
#   out tile      : (1, F, TM)  f32    power = re^2 + im^2, torch (B, F, nf) layout
# ----------------------------------------------------------------------------
def _stft_power_kernel(ft_ref, cos_ref, sin_ref, out_ref):
    ft = ft_ref[0]                                                  # (N, TM) bf16
    re = jnp.dot(cos_ref[...], ft, preferred_element_type=jnp.float32)   # (F, TM) f32
    im = jnp.dot(sin_ref[...], ft, preferred_element_type=jnp.float32)   # (F, TM) f32
    out_ref[0] = re * re + im * im


def _stft_power_call(frames_t, cos_b, sin_b, tm):
    B, N, nf_pad = frames_t.shape
    F = cos_b.shape[0]
    grid = (B, nf_pad // tm)

    cost = pl.CostEstimate(
        flops=int(2 * 2 * F * N * B * nf_pad + 3 * F * B * nf_pad),
        transcendentals=0,
        bytes_accessed=int(B * N * nf_pad * 2          # bf16 frames stream
                           + 2 * F * N * 2             # cos + sin basis (bf16)
                           + B * F * nf_pad * 4),      # f32 power output
    )

    return pl.pallas_call(
        _stft_power_kernel,
        out_shape=jax.ShapeDtypeStruct((B, F, nf_pad), jnp.float32),
        grid_spec=pltpu.PrefetchScalarGridSpec(
            num_scalar_prefetch=0,
            grid=grid,
            in_specs=[
                # frames^T: tiled along the frame (lane) axis, auto double-buffered.
                pl.BlockSpec((1, N, tm), lambda b, i: (b, 0, i)),
                # cos / sin bases: full arrays, grid-invariant -> resident in VMEM.
                pl.BlockSpec((F, N), lambda b, i: (0, 0)),
                pl.BlockSpec((F, N), lambda b, i: (0, 0)),
            ],
            out_specs=pl.BlockSpec((1, F, tm), lambda b, i: (b, 0, i)),
        ),
        compiler_params=pltpu.CompilerParams(
            dimension_semantics=("parallel", "parallel"),
            vmem_limit_bytes=32 * 1024 * 1024,
        ),
        cost_estimate=cost,
    )(frames_t, cos_b, sin_b)


# ----------------------------------------------------------------------------
# Basis construction: windowed one-sided DFT, transposed to (F, N), built in
# float64 numpy (matches np.hanning exactly; avoids f32 phase rounding at N=512).
# ----------------------------------------------------------------------------
def _dft_basis_t(n_fft):
    n_freq = n_fft // 2 + 1
    w = np.hanning(n_fft)                                           # symmetric, as in torch module
    n = np.arange(n_fft, dtype=np.float64)[None, :]                 # (1, N)
    f = np.arange(n_freq, dtype=np.float64)[:, None]                # (F, 1)
    phase = 2.0 * np.pi * ((f * n) % n_fft) / n_fft
    cos_t = (w[None, :] * np.cos(phase)).astype(np.float32)         # (F, N)
    sin_t = (-(w[None, :] * np.sin(phase))).astype(np.float32)      # torch.stft imag sign
    return (jnp.asarray(cos_t).astype(jnp.bfloat16),
            jnp.asarray(sin_t).astype(jnp.bfloat16),
            n_freq)


# ----------------------------------------------------------------------------
# Gather-free frame extraction, already transposed to (B, N, nf_pad):
# column j of the result is x[:, j*hop : j*hop + n_fft].
# ----------------------------------------------------------------------------
def _frames_transposed(x, n_fft, hop, nf_pad):
    B, T = x.shape
    needed = (nf_pad - 1) * hop + n_fft
    if needed > T:
        x = jnp.pad(x, ((0, 0), (0, needed - T)))
    if n_fft % hop == 0:
        # overlap = 0.75 -> n_fft = 4 * hop: each frame is 4 consecutive hop-chunks.
        ratio = n_fft // hop
        n_chunks = nf_pad + ratio - 1
        chunks = x[:, :n_chunks * hop].reshape(B, n_chunks, hop)
        parts = [jnp.swapaxes(chunks[:, k:k + nf_pad, :], 1, 2)     # (B, hop, nf_pad)
                 for k in range(ratio)]
        return jnp.concatenate(parts, axis=1)                       # (B, n_fft, nf_pad)
    # General-hop fallback (never hit for overlap=0.75 with these scales).
    idx = jnp.arange(nf_pad)[:, None] * hop + jnp.arange(n_fft)[None, :]
    return jnp.swapaxes(x[:, idx], 1, 2)


# ----------------------------------------------------------------------------
# MSSTFT forward: list of per-scale power spectrograms, torch (B, F, nf) layout.
# ----------------------------------------------------------------------------
class MSSTFT:
    # Frame-tile targets (lane dim of the kernel); multiple of 128.
    _TM_TARGET = {64: 4096, 128: 4096, 256: 2048, 512: 2048}

    def __init__(self, scales=(64, 128, 256, 512), overlap=0.75):
        self.scales = list(scales)
        self.overlap = overlap
        self.bases = [_dft_basis_t(s) for s in self.scales]   # [(cos_bf16, sin_bf16, F)]

    def __call__(self, x):
        # x: (B, T) float32
        B, T = x.shape
        x16 = x.astype(jnp.bfloat16)        # bf16 frame stream: MXU-native, half the HBM bytes
        outs = []
        for scale, (cos_b, sin_b, n_freq) in zip(self.scales, self.bases):
            hop = int((1.0 - self.overlap) * scale)
            nf = (T - scale) // hop + 1

            tm = min(self._TM_TARGET.get(scale, 2048), _round_up(nf, 128))
            # v7x megacore: keep at least 2 grid steps when possible.
            if B * (-(-nf // tm)) < 2 and tm > 128:
                tm = max(128, _round_up(-(-nf // 2), 128))
            nf_pad = _round_up(nf, tm)

            frames_t = _frames_transposed(x16, scale, hop, nf_pad)   # (B, N, nf_pad) bf16
            power = _stft_power_call(frames_t, cos_b, sin_b, tm)     # (B, F, nf_pad) f32
            outs.append(power if nf_pad == nf else power[:, :, :nf]) # (B, F, nf) torch layout
        return outs


# ----------------------------------------------------------------------------
# Reference (plain JAX rfft, float32) for a correctness sanity check.
# ----------------------------------------------------------------------------
def _reference(x, scales, overlap):
    outs = []
    B, T = x.shape
    for scale in scales:
        hop = int((1.0 - overlap) * scale)
        nf = (T - scale) // hop + 1
        idx = jnp.arange(nf)[:, None] * hop + jnp.arange(scale)[None, :]
        frames = x[:, idx]                                     # (B, nf, N) f32
        w = jnp.asarray(np.hanning(scale).astype(np.float32))
        spec = jnp.fft.rfft(frames * w[None, None, :], axis=-1)
        power = (spec.real ** 2 + spec.imag ** 2).astype(jnp.float32)
        outs.append(jnp.transpose(power, (0, 2, 1)))           # (B, F, nf)
    return outs


if __name__ == "__main__":
    key = jax.random.PRNGKey(0)
    B, T = 2, 4096  # T >= max(scales) so every scale has >= 1 frame
    x = jax.random.normal(key, (B, T), dtype=jnp.float32)

    model = MSSTFT()
    outs = model(x)
    for o in outs:
        jax.block_until_ready(o)

    refs = _reference(x, model.scales, model.overlap)
    for o, r, s in zip(outs, refs, model.scales):
        hop = int((1.0 - model.overlap) * s)
        assert o.shape == (B, s // 2 + 1, (T - s) // hop + 1), (o.shape, s)
        r_np = np.asarray(r)
        np.testing.assert_allclose(np.asarray(o), r_np,
                                   rtol=5e-2, atol=1e-2 * float(r_np.max()))

    print("KERNEL_OK")
</pallas_src>

<mosaic_0001>
module attributes {stable_mosaic.version = 11 : i64} {
  func.func @_stft_power_kernel(%arg0: i32, %arg1: i32, %arg2: memref<1x64x256xbf16, #tpu.memory_space<vmem>>, %arg3: memref<33x64xbf16, #tpu.memory_space<vmem>>, %arg4: memref<33x64xbf16, #tpu.memory_space<vmem>>, %arg5: memref<1x33x256xf32, #tpu.memory_space<vmem>>) attributes {dimension_semantics = [#tpu.dimension_semantics<parallel>, #tpu.dimension_semantics<parallel>], iteration_bounds = array<i64: 2, 1>, scalar_prefetch = 0 : i64, scratch_operands = 0 : i64, tpu.core_type = #tpu.core_type<tc>, window_params = [{transform_indices = @transform_0, window_bounds = array<i64: 1, 64, 256>}, {pipeline_mode = #tpu.pipeline_mode<synchronous>, transform_indices = @transform_1, window_bounds = array<i64: 33, 64>}, {pipeline_mode = #tpu.pipeline_mode<synchronous>, transform_indices = @transform_2, window_bounds = array<i64: 33, 64>}, {transform_indices = @transform_3, window_bounds = array<i64: 1, 33, 256>}]} {
    %c0 = arith.constant 0 : index
    %c0_0 = arith.constant 0 : index
    %c0_1 = arith.constant 0 : index
    %0 = vector.load %arg2[%c0, %c0_0, %c0_1] : memref<1x64x256xbf16, #tpu.memory_space<vmem>>, vector<1x64x256xbf16>
    %1 = vector.shape_cast %0 : vector<1x64x256xbf16> to vector<64x256xbf16>
    %c0_2 = arith.constant 0 : index
    %c0_3 = arith.constant 0 : index
    %2 = vector.load %arg3[%c0_2, %c0_3] : memref<33x64xbf16, #tpu.memory_space<vmem>>, vector<33x64xbf16>
    %cst = arith.constant dense<0.000000e+00> : vector<33x256xf32>
    %3 = tpu.matmul %2, %1, %cst {dimension_numbers = #tpu.dot_dimension_numbers<[1], [0], [0], [1], [0, 0, 1, 1], [], []>} : vector<33x64xbf16>, vector<64x256xbf16>, vector<33x256xf32> -> vector<33x256xf32>
    %c0_4 = arith.constant 0 : index
    %c0_5 = arith.constant 0 : index
    %4 = vector.load %arg4[%c0_4, %c0_5] : memref<33x64xbf16, #tpu.memory_space<vmem>>, vector<33x64xbf16>
    %cst_6 = arith.constant dense<0.000000e+00> : vector<33x256xf32>
    %5 = tpu.matmul %4, %1, %cst_6 {dimension_numbers = #tpu.dot_dimension_numbers<[1], [0], [0], [1], [0, 0, 1, 1], [], []>} : vector<33x64xbf16>, vector<64x256xbf16>, vector<33x256xf32> -> vector<33x256xf32>
    %6 = arith.mulf %3, %3 : vector<33x256xf32>
    %7 = arith.mulf %5, %5 : vector<33x256xf32>
    %8 = arith.addf %6, %7 : vector<33x256xf32>
    %c0_7 = arith.constant 0 : index
    %c0_8 = arith.constant 0 : index
    %c0_9 = arith.constant 0 : index
    %9 = vector.load %arg5[%c0_7, %c0_8, %c0_9] : memref<1x33x256xf32, #tpu.memory_space<vmem>>, vector<1x33x256xf32>
    %10 = vector.shape_cast %9 : vector<1x33x256xf32> to vector<33x256xf32>
    %11 = vector.shape_cast %8 : vector<33x256xf32> to vector<1x33x256xf32>
    tpu.vector_store %arg5[%c0_7, %c0_8, %c0_9], %11 {strides = array<i32>} : memref<1x33x256xf32, #tpu.memory_space<vmem>>, vector<1x33x256xf32>,
    return
  }
  func.func @transform_0(%arg0: i32, %arg1: i32) -> (i32, i32, i32) {
    %c0_i32 = arith.constant 0 : i32
    %c0_i32_0 = arith.constant 0 : i32
    return %arg0, %c0_i32, %arg1 : i32, i32, i32
  }
  func.func @transform_1(%arg0: i32, %arg1: i32) -> (i32, i32) {
    %c0_i32 = arith.constant 0 : i32
    %c0_i32_0 = arith.constant 0 : i32
    %c0_i32_1 = arith.constant 0 : i32
    return %c0_i32, %c0_i32_0 : i32, i32
  }
  func.func @transform_2(%arg0: i32, %arg1: i32) -> (i32, i32) {
    %c0_i32 = arith.constant 0 : i32
    %c0_i32_0 = arith.constant 0 : i32
    %c0_i32_1 = arith.constant 0 : i32
    return %c0_i32, %c0_i32_0 : i32, i32
  }
  func.func @transform_3(%arg0: i32, %arg1: i32) -> (i32, i32, i32) {
    %c0_i32 = arith.constant 0 : i32
    %c0_i32_0 = arith.constant 0 : i32
    return %arg0, %c0_i32, %arg1 : i32, i32, i32
  }
}

</mosaic_0001>

<bundles_post_ra>
// kernel: tpu_custom_call.1
= control target key start
LH: loop header
LB: loop body
LE: loop exit
PB: predicated region body
PF: predicated region fallthrough
CT: control target
= control target key end

     0   :  { %8 = vsyncpa [#allocation3], 0  ;;  %s1075_s0 = inlined_call_operand.hbm [shape: bf16[2,64,256], index: 0, kind: input, shape index: {}]   ;;  %s1076_s1 = inlined_call_operand.hbm [shape: bf16[33,64], index: 1, kind: input, shape index: {}]   ;;  %s1077_s2 = inlined_call_operand.hbm [shape: bf16[33,64], index: 2, kind: input, shape index: {}]   ;;  %s1078_s3 = inlined_call_operand.vmem [shape: f32[2,33,256], index: 3, kind: output, shape index: {}]  }
   0x1   :  { %10 = vsyncpa [#allocation3 + $0x1], 0 }
   0x2   :  { %11 = vsyncpa [#allocation5], 0  ;;  %s929_s12 = smov 0   ;;  %s931_s13 = smov 0  }
   0x3   :  { %s933_s14 = smov 0   ;;  %s935_s15 = smov 0  }
   0x4   :  { %s937_s16 = smov 0   ;;  %s939_s17 = smov 0  }
   0x5 LB: > { %s628_s18 = sadd.s32 4294967295, %s899_s17   ;;  %p51_p0 = scmp.ne.s32.totalorder %s883_s13, %s879_s12  ;;  %s899_s17 = sphi %s939_s17, %s17_s17   ;;  %s895_s16 = sphi %s937_s16, %s1091_s16   ;;  %s891_s15 = sphi %s935_s15, %s1090_s15   ;;  %s887_s14 = sphi %s933_s14, %s1089_s14   ;;  %s883_s13 = sphi %s931_s13, %s1088_s13   ;;  %s879_s12 = sphi %s929_s12, %s1087_s12  }
   0x6   : > { %p959_p1 = scmp.eq.s32.totalorder %s628_s18, 0  ;;  %p630_p2 = scmp.ge.s32.totalorder %s899_s17, 1 }
   0x7   : > { %p132_p3 = scmp.lt.s32.totalorder %s899_s17, 3  ;;  %s901_s22 = smov [#allocation4]  }
   0x8   : > { %s1081_s19 = scalar_select %p959_p1, 1, 0 }
   0x9   : > { %p967_p4 = por %p959_p1, %p51_p0  ;;  %p971_p5 = pnand %p630_p2, %p132_p3 }
   0xa   : > { %s144_s23 = sshll.u32 %s901_s22, 4  ;;  %s902_s25 = smov [#allocation6]   ;;  %s145_s23 = int_to_ptr.vmem [resolvable:$true] %s144_s23 }
   0xb   : > { %p676_p6 = pneg %p971_p5  ;;  %s157_s26 = sshll.u32 %s902_s25, 4  ;;  %s158_s26 = int_to_ptr.vmem [resolvable:$true] %s157_s26 }
   0xc   : > { %s776_s27 = scalar_lea.vmem %s145_s23, 320  ;;  %p784_p12 = scmp.lt.s32.totalorder %s145_s23, %s145_s23 }
   0xd   : > { %p979_p7 = pnand %p676_p6, %p959_p1  ;;  %p777_p9 = scmp.ne.s32.totalorder %s145_s23, %s776_s27 }
   0xe   : > { %p785_p13 = scmp.lt.s32.totalorder %s776_s27, %s776_s27 }
   0xf   : > { %p767_p8 = pneg %p979_p7 }
  0x10   : > { %p786_p0 = por %p785_p13, %p784_p12 }
  0x11   : > { %p779_p10 = pnand %p777_p9, %p767_p8 }
  0x13   : > { %p780_p11 = pneg %p779_p10 }
  0x15   : > { %p787_p2 = pnand %p786_p0, %p780_p11 }
  0x17   : > { %790 = shalt.err (!%p787_p2)
}
  0x18   : > { %s903_s28 = smov 64   ;;  %s904_s29 = smov 4  }
  0x19   : > { %679 = dma.hbm_to_vmem [thread:$0]  (!%p979_p7), %s1076_s1, 320, %s145_s23, [#allocation5], %s903_s28, %s903_s28, %s904_s29  }
  0x1a   : > { %s802_s5 = scalar_lea.vmem %s158_s26, 320  ;;  %p810_p10 = scmp.lt.s32.totalorder %s158_s26, %s158_s26 }
  0x1b   : > { %p803_p3 = scmp.ne.s32.totalorder %s158_s26, %s802_s5  ;;  %p811_p1 = scmp.lt.s32.totalorder %s802_s5, %s802_s5 }
  0x1d   : > { %p805_p6 = pnand %p803_p3, %p767_p8  ;;  %p812_p12 = por %p811_p1, %p810_p10 }
  0x1f   : > { %p806_p9 = pneg %p805_p6 }
  0x21   : > { %p813_p11 = pnand %p812_p12, %p806_p9 }
  0x23   : > { %816 = shalt.err (!%p813_p11)
}
  0x24   : > { %682 = dma.hbm_to_vmem [thread:$0]  (!%p979_p7), %s1077_s2, 320, %s158_s26, [#allocation5], %s903_s28, %s903_s28, %s904_s29  }
  0x25   : > { %s29_s8 = sadd.s32 1, %s895_s16  ;;  %s38_s9 = sadd.s32 1, %s887_s14 }
  0x26   : > { %p31_p1 = scmp.ge.s32.totalorder %s29_s8, 2  ;;  %p45_p8 = scmp.ne.s32.totalorder %s887_s14, %s883_s13 }
  0x27   : > { %p46_p13 = scmp.eq.s32.totalorder %s899_s17, 0  ;;  %p689_p0 = scmp.lt.s32.totalorder %s899_s17, 2 }
  0x28   : > { %s1093_s8 = smov (%p31_p1, %s29_s8), 0  ;;  %s171_s10 = sand.u32 1, %s887_s14  }
  0x29   : > { %p47_p2 = por %p46_p13, %p45_p8  ;;  %s33_s11 = ssub.s32 %s895_s16, %s1093_s8 }
  0x2a   : > { %p36_p3 = scmp.eq.s32.totalorder %s33_s11, 0  ;;  %s634_s12 = sshll.u32 %s171_s10, 6 }
  0x2b   : > { %s664_s18 = sshll.u32 %s895_s16, 10  ;;  %s175_s26 = scalar_lea.vmem [#allocation2], %s634_s12 }
  0x2c   : > { %s1014_s22 = scalar_select %p36_p3, %s887_s14, %s38_s9  }
  0x2d   : > { %s183_s25 = scalar_lea.hbm %s1075_s0, %s664_s18  ;;  %s184_s27 = sshll.u32 %s175_s26, 4  ;;  %s185_s27 = int_to_ptr.vmem [resolvable:$true] %s184_s27 }
  0x2e   : > { %p1021_p7 = pnand %p689_p0, %p47_p2  ;;  %s172_s29 = scalar_lea.sflag [#allocation3], %s171_s10 }
  0x2f   : > { %s830_s30 = scalar_lea.vmem %s185_s27, 1024  ;;  %s905_s4 = smov [#allocation2]  }
  0x30   : > { %p819_p6 = pneg %p1021_p7  ;;  %p831_p9 = scmp.ne.s32.totalorder %s185_s27, %s830_s30 }
  0x31   : > { %s835_s5 = sshll.u32 %s905_s4, 4  ;;  %s836_s5 = int_to_ptr.vmem [resolvable:$false] %s835_s5 }
  0x32   : > { %p833_p10 = pnand %p831_p9, %p819_p6  ;;  %s837_s6 = scalar_lea.vmem %s836_s5, 2048 }
  0x33   : > { %p838_p11 = scmp.lt.s32.totalorder %s185_s27, %s836_s5  ;;  %p839_p1 = scmp.lt.s32.totalorder %s837_s6, %s830_s30 }
  0x34   : > { %p834_p12 = pneg %p833_p10 }
  0x35   : > { %p840_p8 = por %p839_p1, %p838_p11 }
  0x37   : > { %p841_p13 = pnand %p840_p8, %p834_p12 }
  0x39   : > { %844 = shalt.err (!%p841_p13)
}
  0x3a   : > { %s906_s7 = smov 128   ;;  %s907_s9 = smov 8  }
  0x3b   : > { %686 = dma.hbm_to_vmem [thread:$0]  (!%p1021_p7), %s183_s25, 1024, %s185_s27, %s172_s29, %s906_s7, %s906_s7, %s907_s9  }
  0x3c   : > { %196 = sbr.rel (%p971_p5) target bundleno = 303 (0x12f), region = 32  ;;  %s198_s10 = sand.u32 (!%p971_p5), 1, %s883_s13  }
  0x3d   : > { %s638_s11 = sshll.u32 (!%p971_p5), %s198_s10, 6  ;;  %s199_s12 = scalar_lea.sflag (!%p971_p5), [#allocation3], %s198_s10 }
  0x3e   : > { %s202_s18 = scalar_lea.vmem (!%p971_p5), [#allocation2], %s638_s11 }
  0x41   : > { %870 = dma.done.wait (%p967_p4), %s199_s12, 1024  }
  0x42   : > { %872 = vsyncadd (%p967_p4), %s199_s12, 4294966272  ;;  %p1086_p0 = scmp.ne.s32.totalorder %s1081_s19, 0 }
  0x44   : > { %874 = dma.done.wait (%p1086_p0), [#allocation5], 640  }
  0x45   : > { %876 = vsyncadd (%p1086_p0), [#allocation5], 4294966656  ;;  %v908_v0 = vmov 0   ;;  %v747_v1 = vld [vmem:[%s202_s18 + $0x34] ss:$8 sps:$4 sm:$0xff]   ;;  %v759_v9 = vld [vmem:[#allocation4] sm:$0xff]  }
  0x46   : > { %357 = vmatprep.mubr.bf16.mxu0 %v908_v0  ;;  %445 = vmatprep.mubr.bf16.mxu1 %v908_v0  ;;  %v749_v2 = vld [vmem:[%s202_s18 + $0x30] ss:$8 sps:$4 sm:$0xff]   ;;  %v750_v3 = vld [vmem:[%s202_s18 + $0x24] ss:$8 sps:$4 sm:$0xff]   ;;  %v752_v4 = vld [vmem:[%s202_s18 + $0x20] ss:$8 sps:$4 sm:$0xff]  }
  0x47   : > { %333 = vmatprep.subr.bf16.mxu0 %v747_v1  ;;  %421 = vmatprep.subr.bf16.mxu1 %v747_v1  ;;  %v753_v5 = vld [vmem:[%s202_s18 + $0x14] ss:$8 sps:$4 sm:$0xff]   ;;  %v755_v6 = vld [vmem:[%s202_s18 + $0x10] ss:$8 sps:$4 sm:$0xff]   ;;  %v756_v7 = vld [vmem:[%s202_s18 + $0x4] ss:$8 sps:$4 sm:$0xff]  }
  0x48   : > { %334 = vmatpush1.bf16.msra.mxu0 %v749_v2  ;;  %422 = vmatpush1.bf16.msra.mxu1 %v749_v2  ;;  %v758_v8 = vld [vmem:[%s202_s18] ss:$8 sps:$4 sm:$0xff]   ;;  %v760_v10 = vld [vmem:[#allocation6] sm:$0xff]   ;;  %vm315_vm0 = vcmask 523264   ;;  %p239_p4 = scmp.lt.s32.totalorder %s891_s15, 1 }
  0x49   : > { %335 = vmatprep.subr.bf16.mxu0 %v750_v3  ;;  %423 = vmatprep.subr.bf16.mxu1 %v750_v3  ;;  %v761_v11 = vld [vmem:[#allocation4 + $0x8] sm:$0xff]   ;;  %v762_v12 = vld [vmem:[#allocation6 + $0x8] sm:$0xff]   ;;  %v763_v13 = vld [vmem:[#allocation4 + $0x10] ss:$0 sps:$4 sm:$0x11]  }
  0x4a   : > { %v764_v14 = vld [vmem:[#allocation6 + $0x10] ss:$0 sps:$4 sm:$0x11]   ;;  %s1095_s15 = smov (!%p239_p4, %s891_s15), 1 }
  0x4b   : > { %s665_s19 = smul.u32 80, %s1095_s15 }
  0x4c   : > { %336 = vmatpush1.bf16.msra.mxu0 %v752_v4  ;;  %424 = vmatpush1.bf16.msra.mxu1 %v752_v4 }
  0x4d   : > { %337 = vmatprep.subr.bf16.mxu0 %v753_v5  ;;  %425 = vmatprep.subr.bf16.mxu1 %v753_v5  ;;  %s1045_s23 = scalar_lea.vmem %s1078_s3, %s665_s19 }
  0x50   : > { %338 = vmatpush1.bf16.msra.mxu0 %v755_v6  ;;  %426 = vmatpush1.bf16.msra.mxu1 %v755_v6 }
  0x51   : > { %339 = vmatprep.subr.bf16.mxu0 %v756_v7  ;;  %427 = vmatprep.subr.bf16.mxu1 %v756_v7 }
  0x54   : > { %340 = vmatpush1.bf16.msra.mxu0 %v758_v8  ;;  %428 = vmatpush1.bf16.msra.mxu1 %v758_v8 }
  0x57   : > { %653 = vmatmul.mubr.msk.bf16.vlgmr.msra.gmra.mxu0 %vm315_vm0, %v759_v9  ;;  %659 = vmatmul.mubr.msk.bf16.vlgmr.msra.gmra.mxu1 %vm315_vm0, %v760_v10 }
  0x58   : > { %367 = vmatprep.mubr.bf16.mxu0 %v908_v0  ;;  %455 = vmatprep.mubr.bf16.mxu1 %v908_v0 }
  0x5f   : > { %654 = vmatmul.mubr.msk.bf16.gmra.mxu0 %vm315_vm0, %v761_v11  ;;  %660 = vmatmul.mubr.msk.bf16.gmra.mxu1 %vm315_vm0, %v762_v12 }
  0x60   : > { %377 = vmatprep.mubr.bf16.mxu0 %v908_v0  ;;  %465 = vmatprep.mubr.bf16.mxu1 %v908_v0 }
  0x67   : > { %655 = vmatmul.mubr.msk.bf16.gmra.mxu0 %vm315_vm0, %v763_v13  ;;  %661 = vmatmul.mubr.msk.bf16.gmra.mxu1 %vm315_vm0, %v764_v14 }
 0x117   : > { %v359_v15 = vpop.f32.mrf.mxu0  ;;  %v447_v16 = vpop.f32.mrf.mxu1 }
 0x118   : > { %v474_v17 = vmul.f32 %v359_v15, %v359_v15  ;;  %v484_v18 = vmul.f32 %v447_v16, %v447_v16 }
 0x119   : > { %v361_v19 = vpop.f32.mrf.mxu0  ;;  %v449_v20 = vpop.f32.mrf.mxu1 }
 0x11a   : > { %v494_v21 = vadd.f32 %v484_v18, %v474_v17  ;;  %v475_v22 = vmul.f32 %v361_v19, %v361_v19  ;;  %v485_v23 = vmul.f32 %v449_v20, %v449_v20 }
 0x11b   : > { %v363_v24 = vpop.f32.mrf.mxu0  ;;  %v451_v25 = vpop.f32.mrf.mxu1 }
 0x11c   : > { %504 = vst [vmem:[%s1045_s23] sm:$0xff] %v494_v21  ;;  %v495_v26 = vadd.f32 %v485_v23, %v475_v22  ;;  %v476_v27 = vmul.f32 %v363_v24, %v363_v24  ;;  %v486_v28 = vmul.f32 %v451_v25, %v451_v25 }
 0x11d   : > { %v365_v29 = vpop.f32.mrf.mxu0  ;;  %v453_v30 = vpop.f32.mrf.mxu1 }
 0x11e   : > { %505 = vst [vmem:[%s1045_s23 + $0x8] sm:$0xff] %v495_v26  ;;  %v496_v31 = vadd.f32 %v486_v28, %v476_v27  ;;  %v477_v32 = vmul.f32 %v365_v29, %v365_v29  ;;  %v487_v33 = vmul.f32 %v453_v30, %v453_v30 }
 0x11f   : > { %v369_v34 = vpop.f32.mrf.mxu0  ;;  %v457_v35 = vpop.f32.mrf.mxu1 }
 0x120   : > { %506 = vst [vmem:[%s1045_s23 + $0x10] sm:$0xff] %v496_v31  ;;  %v497_v36 = vadd.f32 %v487_v33, %v477_v32  ;;  %v478_v37 = vmul.f32 %v369_v34, %v369_v34  ;;  %v488_v38 = vmul.f32 %v457_v35, %v457_v35 }
 0x121   : > { %v371_v39 = vpop.f32.mrf.mxu0  ;;  %v459_v40 = vpop.f32.mrf.mxu1 }
 0x122   : > { %507 = vst [vmem:[%s1045_s23 + $0x18] sm:$0xff] %v497_v36  ;;  %v498_v41 = vadd.f32 %v488_v38, %v478_v37  ;;  %v479_v42 = vmul.f32 %v371_v39, %v371_v39  ;;  %v489_v43 = vmul.f32 %v459_v40, %v459_v40 }
 0x123   : > { %v373_v44 = vpop.f32.mrf.mxu0  ;;  %v461_v45 = vpop.f32.mrf.mxu1 }
 0x124   : > { %508 = vst [vmem:[%s1045_s23 + $0x20] sm:$0xff] %v498_v41  ;;  %v499_v46 = vadd.f32 %v489_v43, %v479_v42  ;;  %v480_v47 = vmul.f32 %v373_v44, %v373_v44  ;;  %v490_v48 = vmul.f32 %v461_v45, %v461_v45 }
 0x125   : > { %v375_v49 = vpop.f32.mrf.mxu0  ;;  %v463_v50 = vpop.f32.mrf.mxu1 }
 0x126   : > { %509 = vst [vmem:[%s1045_s23 + $0x28] sm:$0xff] %v499_v46  ;;  %v500_v51 = vadd.f32 %v490_v48, %v480_v47  ;;  %v481_v52 = vmul.f32 %v375_v49, %v375_v49  ;;  %v491_v53 = vmul.f32 %v463_v50, %v463_v50 }
 0x127   : > { %v379_v54 = vpop.f32.mrf.mxu0  ;;  %v467_v55 = vpop.f32.mrf.mxu1 }
 0x128   : > { %510 = vst [vmem:[%s1045_s23 + $0x30] sm:$0xff] %v500_v51  ;;  %v501_v56 = vadd.f32 %v491_v53, %v481_v52  ;;  %v482_v57 = vmul.f32 %v379_v54, %v379_v54  ;;  %v492_v58 = vmul.f32 %v467_v55, %v467_v55 }
 0x129   : > { %v381_v59 = vpop.f32.mrf.mxu0  ;;  %v469_v60 = vpop.f32.mrf.mxu1 }
 0x12a   : > { %511 = vst [vmem:[%s1045_s23 + $0x38] sm:$0xff] %v501_v56  ;;  %v502_v61 = vadd.f32 %v492_v58, %v482_v57  ;;  %v483_v62 = vmul.f32 %v381_v59, %v381_v59  ;;  %v493_v63 = vmul.f32 %v469_v60, %v469_v60 }
 0x12b   : > { %v383_v0 = vpop.f32.mrf.mxu0  ;;  %v471_v1 = vpop.f32.mrf.mxu1 }
 0x12c   : > { %512 = vst [vmem:[%s1045_s23 + $0x40] sm:$0x1] %v502_v61  ;;  %v503_v2 = vadd.f32 %v493_v63, %v483_v62 }
 0x12d   : > { %v384_v3 = vpop.f32.mrf.mxu0  ;;  %v472_v4 = vpop.f32.mrf.mxu1 }
 0x12e   : > { %513 = vst [vmem:[%s1045_s23 + $0x48] sm:$0x1] %v503_v2 }
 0x12f PF: > { %s17_s17 = sadd.s32 1, %s899_s17   ;;  %s1087_s12 = smov %s883_s13 }
 0x130   : > { %p14_p5 = scmp.ge.s32.totalorder %s17_s17, 4   ;;  %s1088_s13 = smov %s887_s14 }
 0x131   : > { %s1089_s14 = smov %s1014_s22  ;;  %s1090_s15 = smov %s895_s16 }
 0x132   : > { %s1091_s16 = smov %s1093_s8  ;;  %16 = sbr.rel (!%p14_p5) target bundleno = 5 (0x5), region = 80 }
 0x137   :  { %544 = vsyncpa [#allocation3], 1 }
 0x138   :  { %546 = vsyncpa [#allocation3 + $0x1], 1 }
 0x139   :  { %547 = vsyncpa [#allocation5], 1 }

</bundles_post_ra>
